<compile_context>
chip_gen: v5e
topology: v5e:2x2
jax: 0.10.0
libtpu: 0.0.40
codegen_flags: <defaults>
</compile_context>

<pallas_src>
import jax
import jax.numpy as jnp
from jax.experimental import pallas as pl
from jax.experimental.pallas import tpu as pltpu


def _round_up(a: int, b: int) -> int:
    return ((a + b - 1) // b) * b


def _cdiv(a: int, b: int) -> int:
    return (a + b - 1) // b


def _choose_tile_m(requested: int, rows: int) -> int:
    """Row-tile size: multiple of 128 when large (16 when tiny), and at least
    two row tiles when there is enough work so both TensorCores share the
    'parallel' row axis."""
    rows16 = _round_up(rows, 16)
    tm = max(16, min(requested, rows16))
    tm = _round_up(tm, 128) if tm > 128 else _round_up(tm, 16)
    if rows16 > 256 and _cdiv(rows16, tm) < 2:
        tm = _round_up(_cdiv(rows16, 2), 128)
    return tm


def prepare_channel_mixing_params(time_mix_k, time_mix_r, wk, wv, wr, *, tile_f=512):
    """One-time (init-time) parameter preparation.

    Zero-pads to lane-dense shapes and casts weights to bf16 ONCE, so the
    per-call path does not re-read f32 weights and re-write bf16 copies
    (hundreds of MiB of un-hidden HBM traffic at real RWKV sizes).

    Weights are expected in matmul layout: wk (C, F), wv (F, C), wr (C, C)
    (i.e. the transpose of torch nn.Linear.weight).
    """
    C, F = wk.shape
    assert wv.shape == (F, C) and wr.shape == (C, C)

    Cp = _round_up(C, 128)
    Fp = _round_up(F, 128)
    tile_f = _round_up(min(tile_f, Fp), 128)
    Fp = _round_up(Fp, tile_f)
    num_f = Fp // tile_f

    # Gate weight (Wr) column tiling: the first n_r f-steps each compute one
    # (tile_m, tile_rc) block of sigmoid(xr @ Wr).  Requires n_r <= num_f.
    tile_rc = _round_up(_cdiv(Cp, num_f), 128)
    n_r = _cdiv(Cp, tile_rc)
    Crp = n_r * tile_rc          # padded gate width (>= Cp)

    f32, bf16 = jnp.float32, jnp.bfloat16
    return dict(
        C=C, F=F, Cp=Cp, Fp=Fp, tile_f=tile_f, num_f=num_f,
        tile_rc=tile_rc, n_r=n_r, Crp=Crp,
        tmk=jnp.pad(time_mix_k.reshape(1, C).astype(f32), ((0, 0), (0, Cp - C))),
        tmr=jnp.pad(time_mix_r.reshape(1, C).astype(f32), ((0, 0), (0, Cp - C))),
        wk=jnp.pad(wk, ((0, Cp - C), (0, Fp - F))).astype(bf16),
        wv=jnp.pad(wv, ((0, Fp - F), (0, Cp - C))).astype(bf16),
        wr=jnp.pad(wr, ((0, Cp - C), (0, Crp - C))).astype(bf16),
    )


def _make_channel_mixing_kernel(*, n_r: int, tile_rc: int, Cp: int):
    def kernel(x_ref, xs_ref, tmk_ref, tmr_ref, wk_ref, wv_ref, wr_ref,
               o_ref, gate_sc, acc_sc):
        # Grid = (row_tiles, f_tiles); f (feedforward reduction) innermost,
        # sequential ("arbitrary").
        f = pl.program_id(1)

        x = x_ref[...].astype(jnp.float32)      # resident over f (VMEM load)
        xs = xs_ref[...].astype(jnp.float32)    # token-shifted rows

        @pl.when(f == 0)
        def _():
            acc_sc[...] = jnp.zeros_like(acc_sc)

        # Gate: one (tile_m, tile_rc) column block of sigmoid(xr @ Wr) per
        # f-step for the first n_r steps; Wr streams instead of sitting
        # resident in VMEM.  xr recomputed from resident blocks (cheap VPU).
        @pl.when(f < n_r)
        def _():
            tmr = tmr_ref[...]
            xr = x * tmr + xs * (1.0 - tmr)
            r = jnp.dot(xr.astype(jnp.bfloat16), wr_ref[...],
                        preferred_element_type=jnp.float32)
            gate_sc[f] = jax.nn.sigmoid(r)

        # to_K -> relu^2 -> partial to_V for this F slice; accumulate in f32.
        tmk = tmk_ref[...]
        xk = (x * tmk + xs * (1.0 - tmk)).astype(jnp.bfloat16)
        k = jnp.dot(xk, wk_ref[...], preferred_element_type=jnp.float32)
        k = jnp.square(jnp.maximum(k, 0.0))
        acc_sc[...] += jnp.dot(k.astype(jnp.bfloat16), wv_ref[...],
                               preferred_element_type=jnp.float32)

        @pl.when(f == pl.num_programs(1) - 1)
        def _():
            acc = acc_sc[...]
            for j in range(n_r):                 # static unroll; n_r is small
                lo = j * tile_rc
                hi = min(lo + tile_rc, Cp)       # 128-aligned static bounds
                o_ref[:, lo:hi] = (gate_sc[j][:, : hi - lo] * acc[:, lo:hi]
                                   ).astype(o_ref.dtype)

    return kernel


def channel_mixing(x, params, *, tile_m=512, vmem_limit_bytes=None):
    """x: (B, T, C) in f32 or bf16; params from prepare_channel_mixing_params."""
    B, T, C = x.shape
    assert C == params["C"]
    Cp, Fp, tile_f = params["Cp"], params["Fp"], params["tile_f"]
    num_f, tile_rc, n_r, Crp = (params["num_f"], params["tile_rc"],
                                params["n_r"], params["Crp"])

    rows = B * T
    tile_m = _choose_tile_m(tile_m, rows)
    Mp = _round_up(rows, tile_m)

    # Token shift (ZeroPad2d((0,0,1,-1))): row t <- row t-1 within each batch,
    # row 0 <- 0.  Computed per batch BEFORE flattening so row-tile seams and
    # batch boundaries need no in-kernel handling.
    # TODO(synk): fuse the shift in-kernel (row-offset access + batch-boundary
    # mask) to avoid materializing a second activation copy per call.
    x_shift = jnp.pad(x, ((0, 0), (1, 0), (0, 0)))[:, :-1, :]

    def flat_pad(a):  # keep input dtype (bf16 activations stay bf16)
        return jnp.pad(a.reshape(rows, C), ((0, Mp - rows), (0, Cp - C)))

    xf, xsf = flat_pad(x), flat_pad(x_shift)

    num_row_tiles = Mp // tile_m
    act_b = xf.dtype.itemsize
    out_b = x.dtype.itemsize
    weight_bytes = 2 * (Cp * Fp + Fp * Cp + Cp * Crp)          # bf16
    cost = pl.CostEstimate(
        flops=2 * Mp * (Cp * Fp + Fp * Cp + Cp * Crp),
        transcendentals=Mp * Crp,                               # sigmoid
        bytes_accessed=(2 * Mp * Cp * act_b                     # x + shifted x
                        + Mp * Cp * out_b                       # output
                        + num_row_tiles * weight_bytes))        # per-row-tile weight streaming

    if vmem_limit_bytes is None:
        est = (2 * 2 * tile_m * Cp * act_b                              # x, xs (double-buffered)
               + 2 * 2 * (Cp * tile_f + tile_f * Cp + Cp * tile_rc)     # bf16 weight blocks
               + 2 * tile_m * Cp * out_b                                # output block
               + 4 * tile_m * (Crp + Cp)                                # gate + acc scratch (f32)
               + 4 * 4 * Cp)                                            # time-mix rows
        vmem_limit_bytes = min(max(int(est * 1.5) + (4 << 20), 32 << 20), 100 << 20)

    kernel = _make_channel_mixing_kernel(n_r=n_r, tile_rc=tile_rc, Cp=Cp)

    out = pl.pallas_call(
        kernel,
        out_shape=jax.ShapeDtypeStruct((Mp, Cp), x.dtype),
        grid_spec=pltpu.PrefetchScalarGridSpec(
            num_scalar_prefetch=0,
            grid=(num_row_tiles, num_f),
            in_specs=[
                pl.BlockSpec((tile_m, Cp), lambda i, f: (i, 0)),          # x
                pl.BlockSpec((tile_m, Cp), lambda i, f: (i, 0)),          # shifted x
                pl.BlockSpec((1, Cp), lambda i, f: (0, 0)),               # time_mix_k
                pl.BlockSpec((1, Cp), lambda i, f: (0, 0)),               # time_mix_r
                pl.BlockSpec((Cp, tile_f), lambda i, f: (0, f)),          # Wk (streams over F)
                pl.BlockSpec((tile_f, Cp), lambda i, f: (f, 0)),          # Wv (streams over F)
                pl.BlockSpec((Cp, tile_rc),
                             lambda i, f: (0, jnp.minimum(f, n_r - 1))),  # Wr (streamed columns)
            ],
            out_specs=pl.BlockSpec((tile_m, Cp), lambda i, f: (i, 0)),
            scratch_shapes=[
                pltpu.VMEM((n_r, tile_m, tile_rc), jnp.float32),  # gate column blocks
                pltpu.VMEM((tile_m, Cp), jnp.float32),            # v accumulator
            ],
        ),
        compiler_params=pltpu.CompilerParams(
            dimension_semantics=("parallel", "arbitrary"),
            vmem_limit_bytes=vmem_limit_bytes,
        ),
        cost_estimate=cost,
    )(xf, xsf, params["tmk"], params["tmr"],
      params["wk"], params["wv"], params["wr"])

    return out[:rows, :C].reshape(B, T, C)


def reference(x, time_mix_k, time_mix_r, wk, wv, wr):
    # Pure-JAX (f32) reference mirroring the PyTorch forward.
    shifted = jnp.pad(x, ((0, 0), (1, 0), (0, 0)))[:, :-1, :]
    xk = x * time_mix_k + shifted * (1.0 - time_mix_k)
    xr = x * time_mix_r + shifted * (1.0 - time_mix_r)
    k = jnp.square(jnp.maximum(xk @ wk, 0.0))
    v = k @ wv
    return jax.nn.sigmoid(xr @ wr) * v


if __name__ == "__main__":
    # Small, module-consistent shapes that still exercise: channel padding
    # (48 -> 128), multiple row tiles (32 rows / tile_m=16), multiple F steps
    # (Fp=256 / tile_f=128), and n_r < num_f (gate finished before last step).
    B, T = 2, 16
    d_model = 48
    dim_feedforward = 192
    layer_id, num_layers = 1, 4

    # Deterministic parameter init (mirrors __init__ for time_mix; synthetic
    # gaussian weights for the Linear layers — no checkpoint loading).
    ratio_1_to_almost0 = 1.0 - layer_id / num_layers
    base = jnp.arange(d_model, dtype=jnp.float32) / d_model
    time_mix_k = jnp.power(base, ratio_1_to_almost0).reshape(1, d_model)
    time_mix_r = jnp.power(base, ratio_1_to_almost0).reshape(1, d_model)

    key = jax.random.PRNGKey(0)
    kx, kk, kv, kr = jax.random.split(key, 4)
    x = jax.random.normal(kx, (B, T, d_model), dtype=jnp.float32)
    wk = jax.random.normal(kk, (d_model, dim_feedforward), jnp.float32) * d_model ** -0.5
    wv = jax.random.normal(kv, (dim_feedforward, d_model), jnp.float32) * dim_feedforward ** -0.5
    wr = jax.random.normal(kr, (d_model, d_model), jnp.float32) * d_model ** -0.5

    # One-time weight prep (hoisted out of the per-call path).
    params = prepare_channel_mixing_params(time_mix_k, time_mix_r, wk, wv, wr,
                                           tile_f=128)

    out = channel_mixing(x, params, tile_m=16)
    out = jax.block_until_ready(out)

    ref = reference(x, time_mix_k, time_mix_r, wk, wv, wr)
    assert out.shape == (B, T, d_model)
    # bf16 matmul operands (f32 accumulate) => small drift vs f32 reference.
    max_err = float(jnp.max(jnp.abs(out - ref)))
    assert jnp.allclose(out, ref, atol=2e-2, rtol=5e-2), f"max abs err {max_err}"

    print("KERNEL_OK")
</pallas_src>

<mosaic_0001>
module attributes {stable_mosaic.version = 11 : i64} {
  func.func @kernel(%arg0: i32, %arg1: i32, %arg2: memref<16x128xf32, #tpu.memory_space<vmem>>, %arg3: memref<16x128xf32, #tpu.memory_space<vmem>>, %arg4: memref<1x128xf32, #tpu.memory_space<vmem>>, %arg5: memref<1x128xf32, #tpu.memory_space<vmem>>, %arg6: memref<128x128xbf16, #tpu.memory_space<vmem>>, %arg7: memref<128x128xbf16, #tpu.memory_space<vmem>>, %arg8: memref<128x128xbf16, #tpu.memory_space<vmem>>, %arg9: memref<16x128xf32, #tpu.memory_space<vmem>>, %arg10: memref<1x16x128xf32, #tpu.memory_space<vmem>>, %arg11: memref<16x128xf32, #tpu.memory_space<vmem>>) attributes {dimension_semantics = [#tpu.dimension_semantics<parallel>, #tpu.dimension_semantics<arbitrary>], iteration_bounds = array<i64: 2, 2>, scalar_prefetch = 0 : i64, scratch_operands = 2 : i64, tpu.core_type = #tpu.core_type<tc>, window_params = [{transform_indices = @transform_0, window_bounds = array<i64: 16, 128>}, {transform_indices = @transform_1, window_bounds = array<i64: 16, 128>}, {pipeline_mode = #tpu.pipeline_mode<synchronous>, transform_indices = @transform_2, window_bounds = array<i64: 1, 128>}, {pipeline_mode = #tpu.pipeline_mode<synchronous>, transform_indices = @transform_3, window_bounds = array<i64: 1, 128>}, {transform_indices = @transform_4, window_bounds = array<i64: 128, 128>}, {transform_indices = @transform_5, window_bounds = array<i64: 128, 128>}, {transform_indices = @transform_6, window_bounds = array<i64: 128, 128>}, {transform_indices = @transform_7, window_bounds = array<i64: 16, 128>}]} {
    %c0 = arith.constant 0 : index
    %c0_0 = arith.constant 0 : index
    %0 = vector.load %arg2[%c0, %c0_0] : memref<16x128xf32, #tpu.memory_space<vmem>>, vector<16x128xf32>
    %c0_1 = arith.constant 0 : index
    %c0_2 = arith.constant 0 : index
    %1 = vector.load %arg3[%c0_1, %c0_2] : memref<16x128xf32, #tpu.memory_space<vmem>>, vector<16x128xf32>
    %c0_i32 = arith.constant 0 : i32
    %2 = arith.cmpi eq, %arg1, %c0_i32 : i32
    %3 = arith.extui %2 : i1 to i32
    %c0_i32_3 = arith.constant 0 : i32
    %4 = arith.cmpi ne, %3, %c0_i32_3 : i32
    scf.if %4 {
      %cst_20 = arith.constant 0.000000e+00 : f32
      %31 = vector.broadcast %cst_20 : f32 to vector<16x128xf32>
      %c0_21 = arith.constant 0 : index
      %c0_22 = arith.constant 0 : index
      %32 = vector.load %arg11[%c0_21, %c0_22] : memref<16x128xf32, #tpu.memory_space<vmem>>, vector<16x128xf32>
      tpu.vector_store %arg11[%c0_21, %c0_22], %31 {strides = array<i32>} : memref<16x128xf32, #tpu.memory_space<vmem>>, vector<16x128xf32>,
    } else {
    }
    %c1_i32 = arith.constant 1 : i32
    %5 = arith.cmpi slt, %arg1, %c1_i32 : i32
    %6 = arith.extui %5 : i1 to i32
    %c0_i32_4 = arith.constant 0 : i32
    %7 = arith.cmpi ne, %6, %c0_i32_4 : i32
    scf.if %7 {
      %c0_20 = arith.constant 0 : index
      %c0_21 = arith.constant 0 : index
      %31 = vector.load %arg5[%c0_20, %c0_21] : memref<1x128xf32, #tpu.memory_space<vmem>>, vector<1x128xf32>
      %32 = vector.broadcast %31 : vector<1x128xf32> to vector<16x128xf32>
      %33 = arith.mulf %0, %32 : vector<16x128xf32>
      %cst_22 = arith.constant 1.000000e+00 : f32
      %34 = vector.broadcast %cst_22 : f32 to vector<1x128xf32>
      %35 = arith.subf %34, %31 : vector<1x128xf32>
      %36 = vector.broadcast %35 : vector<1x128xf32> to vector<16x128xf32>
      %37 = arith.mulf %1, %36 : vector<16x128xf32>
      %38 = arith.addf %33, %37 : vector<16x128xf32>
      %39 = arith.truncf %38 : vector<16x128xf32> to vector<16x128xbf16>
      %c0_23 = arith.constant 0 : index
      %c0_24 = arith.constant 0 : index
      %40 = vector.load %arg8[%c0_23, %c0_24] : memref<128x128xbf16, #tpu.memory_space<vmem>>, vector<128x128xbf16>
      %cst_25 = arith.constant dense<0.000000e+00> : vector<16x128xf32>
      %41 = tpu.matmul %39, %40, %cst_25 {dimension_numbers = #tpu.dot_dimension_numbers<[1], [0], [0], [1], [0, 0, 1, 1], [], []>} : vector<16x128xbf16>, vector<128x128xbf16>, vector<16x128xf32> -> vector<16x128xf32>
      %42 = arith.negf %41 : vector<16x128xf32>
      %43 = math.exp %42 : vector<16x128xf32>
      %cst_26 = arith.constant 1.000000e+00 : f32
      %44 = vector.broadcast %cst_26 : f32 to vector<16x128xf32>
      %45 = arith.addf %44, %43 : vector<16x128xf32>
      %46 = arith.divf %44, %45 : vector<16x128xf32>
      %47 = arith.index_cast %arg1 : i32 to index
      %c0_27 = arith.constant 0 : index
      %c0_28 = arith.constant 0 : index
      %48 = vector.load %arg10[%47, %c0_27, %c0_28] : memref<1x16x128xf32, #tpu.memory_space<vmem>>, vector<1x16x128xf32>
      %49 = vector.shape_cast %48 : vector<1x16x128xf32> to vector<16x128xf32>
      %50 = vector.shape_cast %46 : vector<16x128xf32> to vector<1x16x128xf32>
      tpu.vector_store %arg10[%47, %c0_27, %c0_28], %50 {strides = array<i32>} : memref<1x16x128xf32, #tpu.memory_space<vmem>>, vector<1x16x128xf32>,
    } else {
    }
    %c0_5 = arith.constant 0 : index
    %c0_6 = arith.constant 0 : index
    %8 = vector.load %arg4[%c0_5, %c0_6] : memref<1x128xf32, #tpu.memory_space<vmem>>, vector<1x128xf32>
    %9 = vector.broadcast %8 : vector<1x128xf32> to vector<16x128xf32>
    %10 = arith.mulf %0, %9 : vector<16x128xf32>
    %cst = arith.constant 1.000000e+00 : f32
    %11 = vector.broadcast %cst : f32 to vector<1x128xf32>
    %12 = arith.subf %11, %8 : vector<1x128xf32>
    %13 = vector.broadcast %12 : vector<1x128xf32> to vector<16x128xf32>
    %14 = arith.mulf %1, %13 : vector<16x128xf32>
    %15 = arith.addf %10, %14 : vector<16x128xf32>
    %16 = arith.truncf %15 : vector<16x128xf32> to vector<16x128xbf16>
    %c0_7 = arith.constant 0 : index
    %c0_8 = arith.constant 0 : index
    %17 = vector.load %arg6[%c0_7, %c0_8] : memref<128x128xbf16, #tpu.memory_space<vmem>>, vector<128x128xbf16>
    %cst_9 = arith.constant dense<0.000000e+00> : vector<16x128xf32>
    %18 = tpu.matmul %16, %17, %cst_9 {dimension_numbers = #tpu.dot_dimension_numbers<[1], [0], [0], [1], [0, 0, 1, 1], [], []>} : vector<16x128xbf16>, vector<128x128xbf16>, vector<16x128xf32> -> vector<16x128xf32>
    %cst_10 = arith.constant 0.000000e+00 : f32
    %19 = vector.broadcast %cst_10 : f32 to vector<16x128xf32>
    %20 = arith.maximumf %18, %19 : vector<16x128xf32>
    %21 = arith.mulf %20, %20 : vector<16x128xf32>
    %c0_11 = arith.constant 0 : index
    %c0_12 = arith.constant 0 : index
    %22 = vector.load %arg11[%c0_11, %c0_12] : memref<16x128xf32, #tpu.memory_space<vmem>>, vector<16x128xf32>
    %23 = arith.truncf %21 : vector<16x128xf32> to vector<16x128xbf16>
    %c0_13 = arith.constant 0 : index
    %c0_14 = arith.constant 0 : index
    %24 = vector.load %arg7[%c0_13, %c0_14] : memref<128x128xbf16, #tpu.memory_space<vmem>>, vector<128x128xbf16>
    %cst_15 = arith.constant dense<0.000000e+00> : vector<16x128xf32>
    %25 = tpu.matmul %23, %24, %cst_15 {dimension_numbers = #tpu.dot_dimension_numbers<[1], [0], [0], [1], [0, 0, 1, 1], [], []>} : vector<16x128xbf16>, vector<128x128xbf16>, vector<16x128xf32> -> vector<16x128xf32>
    %26 = arith.addf %22, %25 : vector<16x128xf32>
    %c0_16 = arith.constant 0 : index
    %c0_17 = arith.constant 0 : index
    %27 = vector.load %arg11[%c0_16, %c0_17] : memref<16x128xf32, #tpu.memory_space<vmem>>, vector<16x128xf32>
    tpu.vector_store %arg11[%c0_16, %c0_17], %26 {strides = array<i32>} : memref<16x128xf32, #tpu.memory_space<vmem>>, vector<16x128xf32>,
    %c1_i32_18 = arith.constant 1 : i32
    %28 = arith.cmpi eq, %arg1, %c1_i32_18 : i32
    %29 = arith.extui %28 : i1 to i32
    %c0_i32_19 = arith.constant 0 : i32
    %30 = arith.cmpi ne, %29, %c0_i32_19 : i32
    scf.if %30 {
      %c0_20 = arith.constant 0 : index
      %c0_21 = arith.constant 0 : index
      %31 = vector.load %arg11[%c0_20, %c0_21] : memref<16x128xf32, #tpu.memory_space<vmem>>, vector<16x128xf32>
      %c0_22 = arith.constant 0 : index
      %c0_23 = arith.constant 0 : index
      %c0_24 = arith.constant 0 : index
      %32 = vector.load %arg10[%c0_22, %c0_23, %c0_24] : memref<1x16x128xf32, #tpu.memory_space<vmem>>, vector<1x16x128xf32>
      %33 = vector.shape_cast %32 : vector<1x16x128xf32> to vector<16x128xf32>
      %34 = arith.mulf %33, %31 : vector<16x128xf32>
      %c0_25 = arith.constant 0 : index
      %c0_26 = arith.constant 0 : index
      %35 = vector.load %arg9[%c0_25, %c0_26] : memref<16x128xf32, #tpu.memory_space<vmem>>, vector<16x128xf32>
      tpu.vector_store %arg9[%c0_25, %c0_26], %34 {strides = array<i32>} : memref<16x128xf32, #tpu.memory_space<vmem>>, vector<16x128xf32>,
    } else {
    }
    return
  }
  func.func @transform_0(%arg0: i32, %arg1: i32) -> (i32, i32) {
    %c0_i32 = arith.constant 0 : i32
    %c0_i32_0 = arith.constant 0 : i32
    return %arg0, %c0_i32 : i32, i32
  }
  func.func @transform_1(%arg0: i32, %arg1: i32) -> (i32, i32) {
    %c0_i32 = arith.constant 0 : i32
    %c0_i32_0 = arith.constant 0 : i32
    return %arg0, %c0_i32 : i32, i32
  }
  func.func @transform_2(%arg0: i32, %arg1: i32) -> (i32, i32) {
    %c0_i32 = arith.constant 0 : i32
    %c0_i32_0 = arith.constant 0 : i32
    %c0_i32_1 = arith.constant 0 : i32
    return %c0_i32, %c0_i32_0 : i32, i32
  }
  func.func @transform_3(%arg0: i32, %arg1: i32) -> (i32, i32) {
    %c0_i32 = arith.constant 0 : i32
    %c0_i32_0 = arith.constant 0 : i32
    %c0_i32_1 = arith.constant 0 : i32
    return %c0_i32, %c0_i32_0 : i32, i32
  }
  func.func @transform_4(%arg0: i32, %arg1: i32) -> (i32, i32) {
    %c0_i32 = arith.constant 0 : i32
    %c0_i32_0 = arith.constant 0 : i32
    return %c0_i32, %arg1 : i32, i32
  }
  func.func @transform_5(%arg0: i32, %arg1: i32) -> (i32, i32) {
    %c0_i32 = arith.constant 0 : i32
    %c0_i32_0 = arith.constant 0 : i32
    return %arg1, %c0_i32 : i32, i32
  }
  func.func @transform_6(%arg0: i32, %arg1: i32) -> (i32, i32) {
    %c0_i32 = arith.constant 0 : i32
    %0 = arith.minsi %arg1, %c0_i32 : i32
    %c0_i32_0 = arith.constant 0 : i32
    %c0_i32_1 = arith.constant 0 : i32
    return %c0_i32_0, %0 : i32, i32
  }
  func.func @transform_7(%arg0: i32, %arg1: i32) -> (i32, i32) {
    %c0_i32 = arith.constant 0 : i32
    %c0_i32_0 = arith.constant 0 : i32
    return %arg0, %c0_i32 : i32, i32
  }
}

</mosaic_0001>

<bundles_post_ra>
// kernel: tpu_custom_call.1
= control target key start
LH: loop header
LB: loop body
LE: loop exit
PB: predicated region body
PF: predicated region fallthrough
CT: control target
= control target key end

     0   :  { %s2090_s0 = inlined_call_operand.hbm [shape: f32[32,128], index: 0, kind: input, shape index: {}]   ;;  %s2091_s1 = inlined_call_operand.hbm [shape: f32[32,128], index: 1, kind: input, shape index: {}]   ;;  %s2092_s2 = inlined_call_operand.vmem [shape: f32[1,128], index: 2, kind: input, shape index: {}]   ;;  %s2093_s3 = inlined_call_operand.vmem [shape: f32[1,128], index: 3, kind: input, shape index: {}]   ;;  %s2094_s4 = inlined_call_operand.hbm [shape: bf16[128,256], index: 4, kind: input, shape index: {}]   ;;  %s2095_s5 = inlined_call_operand.hbm [shape: bf16[256,128], index: 5, kind: input, shape index: {}]   ;;  %s2096_s6 = inlined_call_operand.hbm [shape: bf16[128,128], index: 6, kind: input, shape index: {}]   ;;  %s2097_s7 = inlined_call_operand.hbm [shape: f32[32,128], index: 7, kind: output, shape index: {}]  }
   0x1   :  { %2122 = sst [smem:[#allocation35_spill]] %s2091_s1 }
   0x2   :  { %2123 = sst [smem:[#allocation36_spill]] %s2092_s2 }
   0x3   :  { %2124 = sst [smem:[#allocation37_spill]] %s2093_s3 }
   0x4   :  { %2125 = sst [smem:[#allocation38_spill]] %s2095_s5 }
   0x5   :  { %2126 = sst [smem:[#allocation39_spill]] %s2097_s7 }
   0x6   :  { %12 = vsyncpa [#allocation5], 0 }
   0x7   :  { %14 = vsyncpa [#allocation5 + $0x1], 0 }
   0x8   :  { %15 = vsyncpa [#allocation8], 0 }
   0x9   :  { %17 = vsyncpa [#allocation8 + $0x1], 0 }
   0xa   :  { %18 = vsyncpa [#allocation11], 0 }
   0xb   :  { %20 = vsyncpa [#allocation11 + $0x1], 0 }
   0xc   :  { %21 = vsyncpa [#allocation6], 0 }
   0xd   :  { %23 = vsyncpa [#allocation6 + $0x1], 0  ;;  %s1695_s24 = smov 0   ;;  %s1697_s25 = smov 0  }
   0xe   :  { %s1699_s26 = smov 0   ;;  %s1701_s27 = smov 0  }
   0xf   :  { %s1703_s28 = smov 0   ;;  %s1705_s29 = smov 0  }
  0x10   :  { %s1707_s30 = smov 0   ;;  %s1709_s8 = smov 0  }
  0x11   :  { %s1711_s9 = smov 0   ;;  %s1713_s10 = smov 0  }
  0x12   :  { %s1715_s11 = smov 0   ;;  %s1717_s12 = smov 0  }
  0x13   :  { %s1719_s13 = smov 0  }
  0x14 LB: > { %2127 = sst [smem:[#allocation20_spill]] %s1609_s27  ;;  %s1761_s14 = sadd.s32 4294967295, %s1645_s13   ;;  %s1645_s13 = sphi %s1719_s13, %s29_s13   ;;  %s1641_s12 = sphi %s1717_s12, %s2193_s12   ;;  %s1637_s11 = sphi %s1715_s11, %s2192_s11   ;;  %s1633_s10 = sphi %s1713_s10, %s2191_s10   ;;  %s1629_s9 = sphi %s1711_s9, %s2190_s9   ;;  %s1625_s8 = sphi %s1709_s8, %s2189_s8   ;;  %s1621_s30 = sphi %s1707_s30, %s2188_s30   ;;  %s1617_s29 = sphi %s1705_s29, %s2182_s29   ;;  %s1613_s28 = sphi %s1703_s28, %s2181_s28   ;;  %s1609_s27 = sphi %s1701_s27, %s2180_s27   ;;  %s1605_s26 = sphi %s1699_s26, %s2179_s26   ;;  %s1601_s25 = sphi %s1697_s25, %s2054_s25   ;;  %s1597_s24 = sphi %s1695_s24, %s2187_s24  }
  0x15   : > { %2128 = sst [smem:[#allocation21_spill]] %s1613_s28  ;;  %s1015_s15 = sadd.s32 4294967294, %s1645_s13  }
  0x16   : > { %2129 = sst [smem:[#allocation22_spill]] %s1617_s29  ;;  %s38_s16 = sadd.s32 1, %s1637_s11 }
  0x17   : > { %2130 = sst [smem:[#allocation23_spill]] %s1621_s30  ;;  %s41_s17 = sadd.s32 1, %s1641_s12 }
  0x18   : > { %2131 = sst [smem:[#allocation24_spill]] %s1629_s9  ;;  %p39_p0 = scmp.ge.s32.totalorder %s38_s16, 2 }
  0x19   : > { %2132 = sst [smem:[#allocation25_spill]] %s1633_s10  ;;  %s48_s18 = sadd.s32 1, %s1625_s8 }
  0x1a   : > { %p55_p1 = scmp.ne.s32.totalorder %s1625_s8, %s1621_s30  ;;  %p56_p2 = scmp.eq.s32.totalorder %s1645_s13, 0 }
  0x1b   : > { %s2195_s16 = smov (%p39_p0, %s38_s16), 0  ;;  %s2197_s17 = smov (!%p39_p0, %s41_s17), %s1641_s12 }
  0x1c   : > { %2133 = sst [smem:[#allocation26_spill]] %s2195_s16  ;;  %p1775_p3 = por %p56_p2, %p55_p1 }
  0x1d   : > { %p61_p4 = scmp.ne.s32.totalorder %s1621_s30, %s1617_s29  ;;  %p43_p5 = scmp.ge.s32.totalorder %s2197_s17, 2 }
  0x1e   : > { %p62_p6 = scmp.eq.s32.totalorder %s1761_s14, 0  ;;  %p235_p7 = scmp.eq.s32.totalorder %s1761_s14, 3 }
  0x1f   : > { %p241_p8 = scmp.eq.s32.totalorder %s1015_s15, 3  ;;  %s2199_s17 = smov (%p43_p5, %s2197_s17), 0 }
  0x20   : > { %2135 = sst [smem:[#allocation27_spill]] %s2199_s17  ;;  %p1787_p9 = por %p62_p6, %p61_p4 }
  0x21   : > { %p1791_p10 = por %p235_p7, %p55_p1  ;;  %s45_s22 = ssub.s32 %s1641_s12, %s2199_s17 }
  0x22   : > { %s2136_s20 = scalar_select %p1787_p9, 1, 0 }
  0x23   : > { %s2138_s21 = scalar_select %p1791_p10, 1, 0 }
  0x24   : > { %2137 = sst [smem:[#allocation28_spill]] %s2136_s20  ;;  %p1797_p11 = por %p241_p8, %p61_p4 }
  0x25   : > { %2139 = sst [smem:[#allocation29_spill]] %s2138_s21  ;;  %p46_p12 = scmp.eq.s32.totalorder %s45_s22, 0 }
  0x26   : > { %s2140_s23 = scalar_select %p1797_p11, 1, 0 }
  0x27   : > { %p2108_p13 = scmp.lt.s32.totalorder %s1645_s13, 4  ;;  %s2102_s15 = sand.u32 1, %s1625_s8  }
  0x28   : > { %2141 = sst [smem:[#allocation30_spill]] %s2140_s23  ;;  %s1808_s7 = sshll.u32 %s2102_s15, 4 }
  0x29   : > { %s1804_s29 = scalar_select %p46_p12, %s1625_s8, %s48_s18  }
  0x2a   : > { %s2106_s10 = sshll.u32 %s1641_s12, 4  ;;  %p1815_p0 = pnand %p2108_p13, %p1775_p3 }
  0x2b   : > { %2142 = sst [smem:[#allocation31_spill]] %s1804_s29  ;;  %s2107_s22 = sand.u32 1, %s1645_s13  }
  0x2c   : > { %s2144_s1 = sld [smem:[#allocation35_spill]]  ;;  %s293_s19 = scalar_lea.vmem [#allocation7], %s1808_s7 }
  0x2d   : > { %s301_s21 = sshll.u32 %s293_s19, 4  ;;  %s1828_s2 = scalar_lea.sflag [#allocation8], %s2107_s22  ;;  %s302_s21 = int_to_ptr.vmem [resolvable:$true] %s301_s21 }
  0x2e   : > { %s2109_s23 = smov 128   ;;  %s2111_s18 = smov 8  }
  0x2f   : > { %p1031_p1 = scmp.ge.s32.totalorder %s1645_s13, 1  ;;  %p375_p3 = scmp.lt.s32.totalorder %s1645_s13, 5 }
  0x30   : > { %s139_s19 = ssub.s32 %s1637_s11, %s2195_s16  ;;  %p149_p7 = scmp.ne.s32.totalorder %s1613_s28, %s1609_s27 }
  0x31   : > { %p1838_p4 = pnand %p1031_p1, %p375_p3  ;;  %p140_p5 = scmp.eq.s32.totalorder %s139_s19, 0 }
  0x32   : > { %s298_s29 = scalar_lea.hbm %s2144_s1, %s2106_s10  ;;  %s142_s10 = sadd.s32 1, %s1613_s28 }
  0x33   : > { %s299_s15 = sshll.u32 %s298_s29, 4  ;;  %p155_p8 = scmp.ne.s32.totalorder %s1609_s27, %s1605_s26  ;;  %s300_s15 = int_to_ptr.hbm [resolvable:$true] %s299_s15 }
  0x34   : > { %1191 = dma.hbm_to_vmem [thread:$0]  (!%p1815_p0), %s300_s15, 256, %s302_s21, %s1828_s2, %s2109_s23, %s2109_s23, %s2111_s18  }
  0x35   : > { %s2145_s29 = scalar_select %p1838_p4, 1, 0 }
  0x36   : > { %s1850_s22 = scalar_select %p140_p5, %s1613_s28, %s142_s10  }
  0x37   : > { %2146 = sst [smem:[#allocation32_spill]] %s2145_s29  ;;  %p151_p12 = por %p149_p7, %p56_p2 }
  0x38   : > { %2147 = sst [smem:[#allocation33_spill]] %s1850_s22  ;;  %p1856_p13 = por %p155_p8, %p62_p6 }
  0x39   : > { %s313_s15 = sand.u32 1, %s1613_s28   ;;  %p2150_p1 = scmp.lt.s32.totalorder %s1645_s13, 4 }
  0x3a   : > { %s2148_s21 = scalar_select %p1856_p13, 1, 0 }
  0x3b   : > { %s1024_s23 = sshll.u32 %s313_s15, 6  ;;  %p1863_p3 = pnand %p2150_p1, %p151_p12 }
  0x3c   : > { %2149 = sst [smem:[#allocation34_spill]] %s2148_s21  ;;  %s315_s26 = scalar_lea.vmem [#allocation9], %s1024_s23 }
  0x3d   : > { %s1867_s10 = sshll.u32 %s315_s26, 4  ;;  %s1147_s19 = sshll.u32 %s1637_s11, 6  ;;  %s323_s10 = int_to_ptr.vmem [resolvable:$true] %s1867_s10 }
  0x3e   : > { %s2152_s5 = sld [smem:[#allocation38_spill]]  ;;  %s336_s15 = scalar_lea.vmem [#allocation10], %s1024_s23 }
  0x3f   : > { %s344_s28 = sshll.u32 %s336_s15, 4  ;;  %s2153_s9 = sand.u32 1, %s1645_s13   ;;  %s345_s28 = int_to_ptr.vmem [resolvable:$true] %s344_s28 }
  0x40   : > { %s1876_s21 = scalar_lea.sflag [#allocation11], %s2153_s9  ;;  %s1649_s26 = smov 64  }
  0x41   : > { %s1650_s27 = smov 4   ;;  %s2154_s1 = sshll.u32 %s1641_s12, 4 }
  0x42   : > { %s276_s9 = scalar_lea.hbm %s2090_s0, %s2154_s1  ;;  %s2156_s30 = smov 8  }
  0x43   : > { %s277_s23 = sshll.u32 %s276_s9, 4  ;;  %s2157_s29 = smov 128   ;;  %s278_s23 = int_to_ptr.hbm [resolvable:$true] %s277_s23 }
  0x44   : > { %s341_s22 = scalar_lea.hbm %s2152_s5, %s1147_s19  ;;  %s271_s19 = scalar_lea.vmem [#allocation4], %s1808_s7 }
  0x45   : > { %s342_s3 = sshll.u32 %s341_s22, 4  ;;  %s279_s15 = sshll.u32 %s271_s19, 4  ;;  %s343_s3 = int_to_ptr.hbm [resolvable:$true] %s342_s3  ;;  %s280_s15 = int_to_ptr.vmem [resolvable:$true] %s279_s15 }
  0x46   : > { %1197 = dma.hbm_to_vmem [thread:$0]  (!%p1863_p3), %s343_s3, 1024, %s345_s28, %s1876_s21, %s1649_s26, %s1649_s26, %s1650_s27  }
  0x47   : > { %s2155_s5 = sand.u32 1, %s1625_s8   ;;  %s1025_s3 = sshll.u32 %s1637_s11, 2 }
  0x48   : > { %s268_s20 = scalar_lea.sflag [#allocation5], %s2155_s5  ;;  %s319_s22 = scalar_lea.hbm %s2094_s4, %s1025_s3 }
  0x49   : > { %1188 = dma.hbm_to_vmem [thread:$0]  (!%p1815_p0), %s278_s23, 256, %s280_s15, %s268_s20, %s2157_s29, %s2157_s29, %s2156_s30  }
  0x4a   : > { %s320_s1 = sshll.u32 %s319_s22, 4  ;;  %p1594_p5 = scmp.ne.s32.totalorder %s1601_s25, 0  ;;  %s321_s1 = int_to_ptr.hbm [resolvable:$true] %s320_s1 }
  0x4b   : > { %1194 = dma.hbm_to_vmem [thread:$0]  (!%p1863_p3), %s321_s1, 1024, %s323_s10, %s1828_s2, %s2157_s29, %s1649_s26, %s1650_s27  }
  0x4c   : > { %p207_p7 = por %p1594_p5, %p56_p2  ;;  %p211_p8 = scmp.ne.s32.totalorder %s1601_s25, %s1597_s24 }
  0x4d   : > { %s365_s17 = sshll.u32 %s2096_s6, 4  ;;  %s1651_s20 = smov [#allocation12]   ;;  %s366_s17 = int_to_ptr.hbm [resolvable:$true] %s365_s17 }
  0x4e   : > { %p1914_p12 = por %p211_p8, %p62_p6  ;;  %s367_s9 = sshll.u32 %s1651_s20, 4  ;;  %s368_s9 = int_to_ptr.vmem [resolvable:$true] %s367_s9 }
  0x4f   : > { %p2159_p0 = pmov %p2150_p1  ;;  %s1456_s2 = sshra.s32 %s366_s17, 4  ;;  %s1457_s2 = int_to_ptr.hbm [resolvable:$true] %s1456_s2 }
  0x50   : > { %s1458_s18 = scalar_lea.hbm %s1457_s2, 64  ;;  %s1463_s10 = scalar_lea.hbm %s2096_s6, 64 }
  0x51   : > { %p1198_p1 = pnand %p2159_p0, %p207_p7  ;;  %p1459_p2 = scmp.ne.s32.totalorder %s1457_s2, %s1458_s18 }
  0x52   : > { %p1465_p8 = scmp.lt.s32.totalorder %s1463_s10, %s1458_s18 }
  0x53   : > { %p1460_p3 = pneg %p1198_p1 }
  0x55   : > { %p1461_p5 = pnand %p1460_p3, %p1459_p2 }
  0x57   : > { %p1462_p6 = pneg %p1461_p5 }
  0x59   : > { %p1467_p11 = pnand %p1465_p8, %p1462_p6 }
  0x5b   : > { %1470 = shalt.err (!%p1467_p11)
}
  0x5c   : > { %1200 = dma.hbm_to_vmem [thread:$0]  (!%p1198_p1), %s366_s17, 1024, %s368_s9, %s1876_s21, %s1649_s26, %s1649_s26, %s1650_s27  }
  0x5d   : > { %379 = sbr.rel (%p1838_p4) target bundleno = 687 (0x2af), region = 48  ;;  %s2161_s19 = sld [smem:[#allocation23_spill]] (!%p1838_p4) }
  0x63   : > { %s1933_s3 = sand.u32 1, %s2161_s19  }
  0x64   : > { %s1032_s28 = sshll.u32 %s1933_s3, 4  ;;  %s382_s16 = scalar_lea.sflag [#allocation5], %s1933_s3 }
  0x65   : > { %s385_s22 = scalar_lea.vmem [#allocation4], %s1032_s28 }
  0x66   : > { %1571 = dma.done.wait (%p1787_p9), %s382_s16, 256  }
  0x67   : > { %1573 = vsyncadd (%p1787_p9), %s382_s16, 4294967040  ;;  %s391_s27 = sand.u32 1, %s1761_s14   ;;  %s395_s26 = scalar_lea.vmem [#allocation7], %s1032_s28 }
  0x68   : > { %s392_s21 = scalar_lea.sflag [#allocation8], %s391_s27 }
  0x69   : > { %1575 = dma.done.wait (%p1787_p9), %s392_s21, 256  }
  0x6a   : > { %1577 = vsyncadd (%p1787_p9), %s392_s21, 4294967040  ;;  %s2163_s1 = sld [smem:[#allocation20_spill]] }
  0x70   : > { %s403_s30 = sand.u32 1, %s2163_s1  }
  0x71   : > { %s1034_s17 = sshll.u32 %s403_s30, 6 }
  0x72   : > { %s1947_s20 = scalar_lea.vmem [#allocation9], %s1034_s17 }
  0x73   : > { %1579 = dma.done.wait (%p1856_p13), %s392_s21, 1024  }
  0x74   : > { %1581 = vsyncadd (%p1856_p13), %s392_s21, 4294966272  ;;  %s412_s14 = scalar_lea.sflag [#allocation11], %s391_s27  ;;  %s1953_s9 = scalar_lea.vmem [#allocation10], %s1034_s17 }
  0x75   : > { %1583 = dma.done.wait (%p1856_p13), %s412_s14, 1024  }
  0x76   : > { %1585 = vsyncadd (%p1856_p13), %s412_s14, 4294966272  ;;  %s423_s2 = sand.u32 1, %s1601_s25  }
  0x77   : > { %s1036_s18 = sshll.u32 %s423_s2, 6 }
  0x78   : > { %s1960_s24 = scalar_lea.vmem [#allocation12], %s1036_s18 }
  0x79   : > { %1587 = dma.done.wait (%p1914_p12), %s412_s14, 1024  }
  0x7a   : > { %1589 = vsyncadd (%p1914_p12), %s412_s14, 4294966272  ;;  %v1966_v0 = vld [vmem:[%s385_s22] sm:$0xff]  ;;  %v1968_v1 = vld [vmem:[%s385_s22 + $0x8] sm:$0xff]  ;;  %s1974_s29 = scalar_lea.vmem [#allocation13], %s1032_s28  ;;  %s2165_s10 = sld [smem:[#allocation24_spill]] }
  0x7b   : > { %v1970_v2 = vld [vmem:[%s395_s26] sm:$0xff]  ;;  %v1972_v3 = vld [vmem:[%s395_s26 + $0x8] sm:$0xff] }
  0x80   : > { %p1038_p9 = scmp.ne.s32.totalorder %s2165_s10, 0 }
  0x82   : > { %490 = sbr.rel (%p1038_p9) target bundleno = 138 (0x8a), region = 72 }
  0x87   : > { %v1652_v4 = vmov 0.0  }
  0x88   : > { %491 = vst [vmem:[#allocation3] sm:$0xff] %v1652_v4 }
  0x89   : > { %492 = vst [vmem:[#allocation3 + $0x8] sm:$0xff] %v1652_v4 }
  0x8a PF: > { %s2166_s23 = sld [smem:[#allocation24_spill]] }
  0x90   : > { %p1039_p11 = scmp.ge.s32.totalorder %s2166_s23, 1 }
  0x91   : > { %s2167_s15 = sld [smem:[#allocation37_spill]] (!%p1039_p11) }
  0x92   : > { %496 = sbr.rel (%p1039_p11) target bundleno = 346 (0x15a), region = 76  ;;  %s2168_s22 = sld [smem:[#allocation24_spill]] (!%p1039_p11) }
  0x97   : > { %v1155_v5 = vld [vmem:[%s1960_s24 + $0x38] sm:$0xff]  ;;  %v1154_v6 = vld [vmem:[%s1960_s24 + $0x30] sm:$0xff]  ;;  %v1153_v7 = vld [vmem:[%s1960_s24 + $0x28] sm:$0xff] }
  0x98   : > { %576 = vmatpush.bf16.msra.mxu0 %v1155_v5  ;;  %v1152_v8 = vld [vmem:[%s1960_s24 + $0x20] sm:$0xff]  ;;  %v1151_v11 = vld [vmem:[%s1960_s24 + $0x18] sm:$0xff]  ;;  %v1150_v14 = vld [vmem:[%s1960_s24 + $0x10] sm:$0xff]  ;;  %s1074_s27 = sshll.u32 %s2168_s22, 4 }
  0x99   : > { %v497_v9 = vld [vmem:[%s2167_s15] sm:$0x1]  ;;  %v1149_v19 = vld [vmem:[%s1960_s24 + $0x8] sm:$0xff]  ;;  %s629_s21 = scalar_lea.vmem [#allocation2], %s1074_s27 }
  0x9a   : > { %v503_v10 = vsub.f32 1.0, %v497_v9  ;;  %v1326_v12 = vld [vmem:[%s2167_s15] ss:$0 sm:$0xff] }
  0x9b   : > { %v501_v15 = vmul.f32 %v1326_v12, %v1966_v0  ;;  %v502_v16 = vmul.f32 %v1326_v12, %v1968_v1  ;;  %v1148_v22 = vld [vmem:[%s1960_s24] sm:$0xff] }
  0x9c   : > { %577 = vmatpush.bf16.msra.mxu0 %v1154_v6  ;;  %v505_v13 = vperm.slane %v503_v10, 0 }
  0x9e   : > { %v507_v17 = vmul.f32 %v505_v13, %v1970_v2  ;;  %v508_v18 = vmul.f32 %v505_v13, %v1972_v3 }
  0xa0   : > { %578 = vmatpush.bf16.msra.mxu0 %v1153_v7  ;;  %v509_v20 = vadd.f32 %v507_v17, %v501_v15  ;;  %v510_v21 = vadd.f32 %v508_v18, %v502_v16 }
  0xa2   : > { %v511_v23 = vpack.c.bf16 %v510_v21, %v509_v20 }
  0xa4   : > { %579 = vmatpush.bf16.msra.mxu0 %v1152_v8 }
  0xa8   : > { %580 = vmatpush.bf16.msra.mxu0 %v1151_v11 }
  0xac   : > { %581 = vmatpush.bf16.msra.mxu0 %v1150_v14 }
  0xb0   : > { %582 = vmatpush.bf16.msra.mxu0 %v1149_v19 }
  0xb4   : > { %583 = vmatpush.bf16.msra.mxu0 %v1148_v22 }
  0xb7   : > { %584 = vmatmul.bf16.vlgmr.msra.gmra.mxu0 %v511_v23 }
 0x134   : > { %v585_v24 = vpop.f32.mrf.mxu0 }
 0x135   : > { %v1072_v25 = vmul.f32 -1.442695, %v585_v24 }
 0x137   : > { %1327 = vpow2.f32 %v1072_v25 }
 0x13c   : > { %v587_v26 = vpop.f32.mrf.mxu0 }
 0x13d   : > { %v1328_v27 = vpop.eup %1327  ;;  %v1073_v28 = vmul.f32 -1.442695, %v587_v26 }
 0x13e   : > { %v596_v29 = vadd.f32 1.0, %v1328_v27 }
 0x13f   : > { %1329 = vpow2.f32 %v1073_v28 }
 0x140   : > { %1331 = vrcp.f32 %v596_v29  ;;  %v609_v35 = vand.u32 2147483648, %v596_v29  ;;  %v607_v37 = vand.u32 2147483647, %v596_v29  ;;  %vm603_vm1 = vweird.f32 %v596_v29 }
 0x142   : > { %v610_v40 = vor.u32 1.1754944e-38, %v609_v35  ;;  %vm608_vm3 = vcmp.eq.f32.partialorder %v607_v37, 8.507059e+37 }
 0x145   : > { %v1330_v30 = vpop.eup %1329 }
 0x146   : > { %v1332_v31 = vpop.eup %1331  ;;  %v597_v32 = vadd.f32 1.0, %v1330_v30 }
 0x147   : > { %v599_v33 = vmul.f32 %v1332_v31, %v596_v29  ;;  %vm604_vm0 = vweird.f32 %v1332_v31 }
 0x148   : > { %1333 = vrcp.f32 %v597_v32  ;;  %vm605_vm2 = vmor %vm603_vm1, %vm604_vm0  ;;  %v624_v45 = vand.u32 2147483648, %v597_v32  ;;  %v622_v47 = vand.u32 2147483647, %v597_v32  ;;  %vm618_vm5 = vweird.f32 %v597_v32 }
 0x149   : > { %v600_v34 = vsub.f32 1.0, %v599_v33 }
 0x14a   : > { %v625_v49 = vor.u32 1.1754944e-38, %v624_v45  ;;  %vm623_vm7 = vcmp.eq.f32.partialorder %v622_v47, 8.507059e+37 }
 0x14b   : > { %v601_v36 = vmul.f32 %v1332_v31, %v600_v34 }
 0x14d   : > { %v602_v38 = vadd.f32 %v1332_v31, %v601_v36 }
 0x14e   : > { %v1334_v39 = vpop.eup %1333 }
 0x14f   : > { %v606_v41 = vsel %vm605_vm2, %v1332_v31, %v602_v38  ;;  %v614_v42 = vmul.f32 %v1334_v39, %v597_v32  ;;  %vm619_vm4 = vweird.f32 %v1334_v39 }
 0x150   : > { %v611_v43 = vsel %vm608_vm3, %v610_v40, %v606_v41  ;;  %vm620_vm6 = vmor %vm618_vm5, %vm619_vm4 }
 0x151   : > { %630 = vst [vmem:[%s629_s21] sm:$0xff] %v611_v43  ;;  %v615_v44 = vsub.f32 1.0, %v614_v42 }
 0x153   : > { %v616_v46 = vmul.f32 %v1334_v39, %v615_v44 }
 0x155   : > { %v617_v48 = vadd.f32 %v1334_v39, %v616_v46 }
 0x157   : > { %v621_v50 = vsel %vm620_vm6, %v1334_v39, %v617_v48 }
 0x158   : > { %v626_v51 = vsel %vm623_vm7, %v625_v49, %v621_v50 }
 0x159   : > { %631 = vst [vmem:[%s629_s21 + $0x8] sm:$0xff] %v626_v51 }
 0x15a PF: > { %v1163_v52 = vld [vmem:[%s1947_s20 + $0x38] sm:$0xff]  ;;  %v1162_v53 = vld [vmem:[%s1947_s20 + $0x30] sm:$0xff]  ;;  %v1161_v56 = vld [vmem:[%s1947_s20 + $0x28] sm:$0xff]  ;;  %s2169_s7 = sld [smem:[#allocation36_spill]] }
 0x15b   : > { %711 = vmatpush.bf16.msra.mxu0 %v1163_v52  ;;  %v1171_v54 = vld [vmem:[%s1953_s9 + $0x38] sm:$0xff]  ;;  %v1170_v55 = vld [vmem:[%s1953_s9 + $0x30] sm:$0xff]  ;;  %v1169_v57 = vld [vmem:[%s1953_s9 + $0x28] sm:$0xff] }
 0x15c   : > { %796 = vmatpush.bf16.msra.mxu1 %v1171_v54  ;;  %v1160_v58 = vld [vmem:[%s1947_s20 + $0x20] sm:$0xff]  ;;  %v1159_v62 = vld [vmem:[%s1947_s20 + $0x18] sm:$0xff]  ;;  %v1158_v5 = vld [vmem:[%s1947_s20 + $0x10] sm:$0xff] }
 0x15d   : > { %v1168_v61 = vld [vmem:[%s1953_s9 + $0x20] sm:$0xff]  ;;  %v1157_v10 = vld [vmem:[%s1947_s20 + $0x8] sm:$0xff]  ;;  %v1167_v15 = vld [vmem:[%s1953_s9 + $0x18] sm:$0xff] }
 0x15e   : > { %v1156_v13 = vld [vmem:[%s1947_s20] sm:$0xff]  ;;  %v729_v22 = vld [vmem:[#allocation3] sm:$0xff]  ;;  %v730_v25 = vld [vmem:[#allocation3 + $0x8] sm:$0xff]  ;;  %s2170_s20 = sld [smem:[#allocation24_spill]] }
 0x15f   : > { %712 = vmatpush.bf16.msra.mxu0 %v1162_v53  ;;  %v1164_v16 = vld [vmem:[%s1953_s9] sm:$0xff] }
 0x160   : > { %797 = vmatpush.bf16.msra.mxu1 %v1170_v55  ;;  %v632_v59 = vld [vmem:[%s2169_s7] sm:$0x1] }
 0x161   : > { %v638_v60 = vsub.f32 1.0, %v632_v59  ;;  %v1335_v63 = vld [vmem:[%s2169_s7] ss:$0 sm:$0xff] }
 0x162   : > { %v636_v6 = vmul.f32 %v1335_v63, %v1966_v0  ;;  %v637_v7 = vmul.f32 %v1335_v63, %v1968_v1  ;;  %v1166_v0 = vld [vmem:[%s1953_s9 + $0x10] sm:$0xff]  ;;  %v1165_v1 = vld [vmem:[%s1953_s9 + $0x8] sm:$0xff] }
 0x163   : > { %713 = vmatpush.bf16.msra.mxu0 %v1161_v56  ;;  %v640_v4 = vperm.slane %v638_v60, 0 }
 0x164   : > { %798 = vmatpush.bf16.msra.mxu1 %v1169_v57  ;;  %p1139_p13 = scmp.ne.s32.totalorder %s2170_s20, 1 }
 0x165   : > { %v642_v8 = vmul.f32 %v640_v4, %v1970_v2  ;;  %v643_v9 = vmul.f32 %v640_v4, %v1972_v3 }
 0x167   : > { %714 = vmatpush.bf16.msra.mxu0 %v1160_v58  ;;  %v644_v11 = vadd.f32 %v642_v8, %v636_v6  ;;  %v645_v12 = vadd.f32 %v643_v9, %v637_v7 }
 0x168   : > { %799 = vmatpush.bf16.msra.mxu1 %v1168_v61 }
 0x169   : > { %v646_v14 = vpack.c.bf16 %v645_v12, %v644_v11 }
 0x16b   : > { %715 = vmatpush.bf16.msra.mxu0 %v1159_v62 }
 0x16c   : > { %800 = vmatpush.bf16.msra.mxu1 %v1167_v15 }
 0x16f   : > { %716 = vmatpush.bf16.msra.mxu0 %v1158_v5 }
 0x170   : > { %801 = vmatpush.bf16.msra.mxu1 %v1166_v0 }
 0x173   : > { %717 = vmatpush.bf16.msra.mxu0 %v1157_v10 }
 0x174   : > { %802 = vmatpush.bf16.msra.mxu1 %v1165_v1 }
 0x177   : > { %718 = vmatpush.bf16.msra.mxu0 %v1156_v13 }
 0x178   : > { %803 = vmatpush.bf16.msra.mxu1 %v1164_v16 }
 0x17a   : > { %719 = vmatmul.bf16.vlgmr.msra.gmra.mxu0 %v646_v14 }
 0x1f7   : > { %v720_v2 = vpop.f32.mrf.mxu0 }
 0x1f8   : > { %v725_v3 = vmax.f32 %v720_v2, 0.0 }
 0x1fa   : > { %v727_v19 = vmul.f32 %v725_v3, %v725_v3 }
 0x1ff   : > { %v722_v17 = vpop.f32.mrf.mxu0 }
 0x200   : > { %v726_v18 = vmax.f32 %v722_v17, 0.0 }
 0x202   : > { %v728_v20 = vmul.f32 %v726_v18, %v726_v18 }
 0x204   : > { %v731_v21 = vpack.c.bf16 %v728_v20, %v727_v19 }
 0x206   : > { %804 = vmatmul.bf16.vlgmr.msra.gmra.mxu1 %v731_v21 }
 0x283   : > { %v805_v23 = vpop.f32.mrf.mxu1 }
 0x284   : > { %v810_v24 = vadd.f32 %v805_v23, %v729_v22 }
 0x286   : > { %812 = vst [vmem:[#allocation3] sm:$0xff] %v810_v24 }
 0x28a   : > { %817 = sbr.rel (%p1139_p13) target bundleno = 665 (0x299), region = 80 }
 0x28b   : > { %v807_v26 = vpop.f32.mrf.mxu1 }
 0x28c   : > { %v811_v27 = vadd.f32 %v807_v26, %v730_v25 }
 0x28e   : > { %813 = vst [vmem:[#allocation3 + $0x8] sm:$0xff] %v811_v27 }
 0x28f   : > { %v818_v28 = vld [vmem:[#allocation3] sm:$0xff]  ;;  %v820_v29 = vld [vmem:[#allocation2] sm:$0xff]  ;;  %v821_v32 = vld [vmem:[#allocation2 + $0x8] sm:$0xff] }
 0x290   : > { %v822_v31 = vmul.f32 %v820_v29, %v818_v28 }
 0x292   : > { %824 = vst [vmem:[%s1974_s29] sm:$0xff] %v822_v31 }
 0x295   : > { %v819_v30 = vld [vmem:[#allocation3 + $0x8] sm:$0xff] }
 0x296   : > { %v823_v33 = vmul.f32 %v821_v32, %v819_v30 }
 0x298   : > { %825 = vst [vmem:[%s1974_s29 + $0x8] sm:$0xff] %v823_v33 }
 0x299 PF: > { %s2171_s14 = sld [smem:[#allocation25_spill]]  ;;  %s839_s19 = sshll.u32 %s1974_s29, 4  ;;  %s840_s19 = int_to_ptr.vmem [resolvable:$true] %s839_s19 }
 0x29a   : > { %s2173_s10 = sld [smem:[#allocation39_spill]]  ;;  %s827_s16 = scalar_lea.sflag [#allocation6], %s1933_s3 }
 0x29f   : > { %s1172_s2 = sshll.u32 %s2171_s14, 4 }
 0x2a0   : > { %s2174_s23 = smov %s2173_s10  ;;  %s838_s5 = scalar_lea.hbm %s2173_s10, %s1172_s2 }
 0x2a1   : > { %s841_s28 = sshll.u32 %s838_s5, 4  ;;  %s1506_s1 = scalar_lea.hbm %s2174_s23, 32  ;;  %s842_s28 = int_to_ptr.hbm [resolvable:$true] %s841_s28 }
 0x2a2   : > { %s1500_s22 = sshra.s32 %s842_s28, 4  ;;  %s1501_s22 = int_to_ptr.hbm [resolvable:$true] %s1500_s22 }
 0x2a3   : > { %s1502_s27 = scalar_lea.hbm %s1501_s22, 16  ;;  %p1507_p0 = scmp.lt.s32.totalorder %s1501_s22, %s2174_s23 }
 0x2a4   : > { %p1503_p4 = scmp.ne.s32.totalorder %s1501_s22, %s1502_s27  ;;  %p1508_p1 = scmp.lt.s32.totalorder %s1506_s1, %s1502_s27 }
 0x2a6   : > { %p1504_p7 = pnand %p1503_p4, %p1791_p10  ;;  %p1509_p2 = por %p1508_p1, %p1507_p0 }
 0x2a8   : > { %p1505_p12 = pneg %p1504_p7 }
 0x2aa   : > { %p1510_p3 = pnand %p1509_p2, %p1505_p12 }
 0x2ac   : > { %1513 = shalt.err (!%p1510_p3)
}
 0x2ad   : > { %s1653_s3 = smov 128   ;;  %s1654_s29 = smov 8  }
 0x2ae   : > { %1183 = dma.vmem_to_hbm [thread:$0]  (%p1791_p10), %s840_s19, 256, %s842_s28, %s827_s16, %s1653_s3, %s1653_s3, %s1654_s29  }
 0x2af PF: > { %s2175_s20 = sld [smem:[#allocation22_spill]]  ;;  %p1206_p5 = scmp.ge.s32.totalorder %s1645_s13, 2 }
 0x2b0   : > { %s2176_s14 = sld [smem:[#allocation30_spill]] }
 0x2b5   : > { %s856_s2 = sand.u32 1, %s2175_s20  }
 0x2b6   : > { %p2177_p6 = scmp.ne.s32.totalorder %s2176_s14, 0  ;;  %s857_s18 = scalar_lea.sflag [#allocation6], %s856_s2 }
 0x2b8   : > { %p1202_p8 = pnand %p1206_p5, %p2177_p6 }
 0x2ba   : > { %p1203_p9 = pneg %p1202_p8 }
 0x2bc   : > { %1591 = dma.done.wait (%p1203_p9), %s857_s18, 256  }
 0x2bd   : > { %1593 = vsyncadd (%p1203_p9), %s857_s18, 4294967040  ;;  %s29_s13 = sadd.s32 1, %s1645_s13   ;;  %s2179_s26 = sld [smem:[#allocation20_spill]] }
 0x2be   : > { %p2047_p11 = scmp.ge.s32.totalorder %s29_s13, 6   ;;  %s2180_s27 = sld [smem:[#allocation21_spill]] }
 0x2bf   : > { %s2181_s28 = sld [smem:[#allocation33_spill]]  ;;  %s2187_s24 = smov %s1601_s25 }
 0x2c0   : > { %s2182_s29 = sld [smem:[#allocation23_spill]]  ;;  %s2054_s25 = smov 0  }
 0x2c1   : > { %s2183_s9 = sld [smem:[#allocation31_spill]]  ;;  %s2188_s30 = smov %s1625_s8 }
 0x2c2   : > { %s2184_s5 = sld [smem:[#allocation26_spill]]  ;;  %s2191_s10 = smov %s1641_s12 }
 0x2c3   : > { %s2185_s19 = sld [smem:[#allocation27_spill]] }
 0x2c5   :  { %28 = sbr.rel (!%p2047_p11) target bundleno = 20 (0x14), region = 154 }
 0x2c7   : > { %s2189_s8 = smov %s2183_s9  ;;  %s2190_s9 = smov %s1637_s11 }
 0x2c8   : > { %s2192_s11 = smov %s2184_s5 }
 0x2c9   : > { %s2193_s12 = smov %s2185_s19 }
 0x2ca   :  { %863 = vsyncpa [#allocation5], 1 }
 0x2cb   :  { %865 = vsyncpa [#allocation5 + $0x1], 1 }
 0x2cc   :  { %866 = vsyncpa [#allocation8], 1 }
 0x2cd   :  { %868 = vsyncpa [#allocation8 + $0x1], 1 }
 0x2ce   :  { %869 = vsyncpa [#allocation11], 1 }
 0x2cf   :  { %871 = vsyncpa [#allocation11 + $0x1], 1 }
 0x2d0   :  { %872 = vsyncpa [#allocation6], 1 }
 0x2d1   :  { %874 = vsyncpa [#allocation6 + $0x1], 1 }

</bundles_post_ra>
